<compile_context>
chip_gen: v6e
topology: v6e:2x2x1
jax: 0.10.0
libtpu: 0.0.40
codegen_flags: <defaults>
</compile_context>

<pallas_src>
import functools

import jax
import jax.numpy as jnp
import numpy as np
from jax.experimental import pallas as pl
from jax.experimental.pallas import tpu as pltpu


def _dnngp_kernel(use_bf16_ew, m_left_ref, m_right_ref, x_ref, w1_ref, b1_ref,
                  w2_ref, bias2_ref, w3_ref, fcw_ref, scal_ref, out_ref):
    f32, bf16 = jnp.float32, jnp.bfloat16
    x = x_ref[...]                                            # (TB, L) f32
    L = x.shape[-1]
    m_left = m_left_ref[...]                                  # (1, L), zero at l = 0
    m_right = m_right_ref[...]                                # (1, L), zero at l = L-1

    def stack_taps(h):
        # h: (R, L) f32 -> (3R, L) bf16 with row blocks [h[l-1]; h[l]; h[l+1]],
        # matching the tap order (k = 0, 1, 2) of the concatenated weights.
        # Each tap slab is cast to bf16 BEFORE the concat to halve concat/store
        # traffic of the largest intermediates.
        if use_bf16_ew:
            # v6e/v7x: bf16 VALU -> roll + mask in bf16 (half the vreg footprint).
            hc = h.astype(bf16)
            left = pltpu.roll(hc, shift=1, axis=1) * m_left        # out[l] = h[l-1]
            right = pltpu.roll(hc, shift=L - 1, axis=1) * m_right  # out[l] = h[l+1]
        else:
            # v5e and older: no bf16 VPU -> mask in f32, cast per-slab.
            hc = h.astype(bf16)
            left = (pltpu.roll(h, shift=1, axis=1) * m_left).astype(bf16)
            right = (pltpu.roll(h, shift=L - 1, axis=1) * m_right).astype(bf16)
        return jnp.concatenate([left, hc, right], axis=0)

    # conv1 + ReLU.
    # TODO(synk): nn.Dropout(0.3) is modeled as identity (inference forward).
    h1 = jnp.maximum(
        jnp.dot(w1_ref[...], stack_taps(x), preferred_element_type=f32)
        + b1_ref[...], 0.0)                                   # (TB*C, L)

    # BatchNorm1d (running statistics) is folded into w2 / bias2 by the wrapper.
    # conv2 + ReLU (+ identity dropout).  (On v5e a 3x per-tap accumulating
    # matmul variant would skip this concat; the fused form is best on v6e/v7x.)
    h2 = jnp.maximum(
        jnp.dot(w2_ref[...], stack_taps(h1), preferred_element_type=f32)
        + bias2_ref[...], 0.0)                                # (TB*C, L)

    # conv3 + ReLU (scalar bias b3 read from SMEM).
    h3 = jnp.maximum(
        jnp.dot(w3_ref[...], stack_taps(h2), preferred_element_type=f32)
        + scal_ref[0], 0.0)                                   # (TB, L)

    # flatten(1) + Linear(L, 1): contract fc_w (8, L; row 0 = weights) with
    # h3 (TB, L) over L.  Result is already lane-dense, so the output block is
    # a single unmasked (1, TB) row store.
    res = jax.lax.dot_general(fcw_ref[...], h3,
                              dimension_numbers=(((1,), (1,)), ((), ())),
                              preferred_element_type=f32)     # (8, TB)
    out_ref[...] = res[0:1, :] + scal_ref[1]                  # (1, TB)


def _tpu_defaults():
    """Generation-aware knobs: MXU row count and whether the VPU has bf16."""
    try:
        kind = jax.devices()[0].device_kind.lower()
    except Exception:
        kind = ""
    newer = any(tag in kind for tag in ("v6", "v7", "7x"))
    mxu_rows = 256 if newer else 128     # v5e-class MXU is 128 rows deep/wide
    bf16_vpu = newer                     # bf16 VALU only on v6e/v7x
    return mxu_rows, bf16_vpu


def _pick_batch_tile(N, C, mxu_rows):
    # Fill the MXU M dimension (TB*C ~= mxu_rows) without force-splitting the
    # batch: the grid is a *serial* loop on single-TensorCore chips and each
    # step costs ~0.35 us, so small batches run as a single tile (TB = N).
    # TB must be a multiple of 8 (sublane rule) unless it covers the whole batch.
    target = max(1, mxu_rows // max(C, 1))
    if N <= 8 or N <= target:
        return N
    best = None
    for tb in range(8, min(N, target) + 1, 8):
        if N % tb == 0:
            best = tb
    return best if best is not None else N


def dnngp_forward(x_ncw, p, *, batch_tile=None):
    """x_ncw: (N, 1, L) f32, PyTorch NCW layout.  Returns (N, 1) f32."""
    N, cin, L = x_ncw.shape
    assert cin == 1
    C = p["w1"].shape[0]
    mxu_rows, bf16_vpu = _tpu_defaults()
    TB = _pick_batch_tile(N, C, mxu_rows) if batch_tile is None else batch_tile
    assert N % TB == 0, "batch tile must divide the batch"
    assert TB == N or TB % 8 == 0, "batch tile must be a multiple of 8 (or == N)"
    G = N // TB
    f32, bf16 = jnp.float32, jnp.bfloat16
    eye = jnp.eye(TB, dtype=f32)

    # ---- parameter glue (plain JAX, runs once outside the kernel) ----
    kron_taps = lambda w: [jnp.kron(eye, w[:, :, k]) for k in range(3)]

    # conv1: fused-tap weight (TB*C, 3*TB)
    w1cat = jnp.concatenate(kron_taps(p["w1"]), axis=1).astype(bf16)
    b1_col = jnp.tile(p["b1"], TB).reshape(TB * C, 1).astype(f32)

    # BatchNorm (inference, running stats) folded into conv2.
    bn_scale = p["bn_gamma"] * jax.lax.rsqrt(p["bn_var"] + 1e-5)       # (C,)
    bn_shift = p["bn_beta"] - p["bn_mean"] * bn_scale                  # (C,)
    scale_cols = jnp.tile(bn_scale, TB)                                # (TB*C,)
    shift_col = jnp.tile(bn_shift, TB).reshape(TB * C, 1)              # (TB*C, 1)

    k2 = kron_taps(p["w2"])                                            # 3 x (TB*C, TB*C)
    w2cat = jnp.concatenate([m * scale_cols[None, :] for m in k2],
                            axis=1).astype(bf16)                       # (TB*C, 3*TB*C)

    # Edge-aware additive bias for conv2 (b2 + conv2(BN shift) under "same"
    # zero padding).  At (TB*C, L) f32 this is <= 64 KiB for the current model;
    # if TB*C or L ever grow, keep it at (C, L) and tile in-kernel so it stays
    # inside v7x's smaller VMEM.
    lane = jnp.arange(L)
    valid = jnp.stack([lane >= 1,                                       # tap k=0, delta=-1
                       jnp.ones((L,), bool),                            # tap k=1, delta= 0
                       lane <= L - 2]).astype(f32)                      # tap k=2, delta=+1
    bias2 = jnp.tile(p["b2"], TB).reshape(TB * C, 1)
    for k in range(3):
        bias2 = bias2 + (k2[k] @ shift_col) * valid[k][None, :]        # (TB*C, L)
    bias2 = bias2.astype(f32)

    # conv3: fused-tap weight (TB, 3*TB*C)
    w3cat = jnp.concatenate(kron_taps(p["w3"]), axis=1).astype(bf16)

    # fc weights padded to a full 8-row sublane tile (row 0 holds the weights).
    fcw_pad = jnp.zeros((8, L), f32).at[0, :].set(p["fc_w"].reshape(L))
    scal = jnp.concatenate([p["b3"].reshape(1),
                            p["fc_b"].reshape(1)]).astype(f32)          # [b3, fc_b]

    # Hoisted "same"-padding edge masks, passed in as inputs (no per-step iota).
    mask_dtype = bf16 if bf16_vpu else f32
    m_left = (lane >= 1).astype(mask_dtype).reshape(1, L)
    m_right = (lane <= L - 2).astype(mask_dtype).reshape(1, L)

    x2d = x_ncw.reshape(N, L).astype(f32)

    full = lambda a: pl.BlockSpec(a.shape, lambda i: (0,) * a.ndim)
    smem = pl.BlockSpec(memory_space=pltpu.MemorySpace.SMEM)

    out_rows = pl.pallas_call(
        functools.partial(_dnngp_kernel, bf16_vpu),
        out_shape=jax.ShapeDtypeStruct((G, TB), jnp.float32),
        grid=(G,),
        in_specs=[
            full(m_left), full(m_right),                 # hoisted edge masks
            pl.BlockSpec((TB, L), lambda i: (i, 0)),     # x batch tile
            full(w1cat), full(b1_col),
            full(w2cat), full(bias2),
            full(w3cat),
            full(fcw_pad),
            smem,                                        # [b3, fc_b] scalars
        ],
        out_specs=pl.BlockSpec((1, TB), lambda i: (i, 0)),  # lane-dense output row
        compiler_params=pltpu.CompilerParams(
            dimension_semantics=("parallel",)),
    )(m_left, m_right, x2d, w1cat, b1_col, w2cat, bias2, w3cat, fcw_pad, scal)
    return out_rows.reshape(N, 1)


# ----------------------------- pure-JAX reference ---------------------------
def _ref_conv1d(x, w, b):
    y = jax.lax.conv_general_dilated(
        x, w, window_strides=(1,), padding=((1, 1),),
        dimension_numbers=("NCH", "OIH", "NCH"),
        precision=jax.lax.Precision.HIGHEST)
    return y + b[None, :, None]


def dnngp_reference(x, p):
    h = jax.nn.relu(_ref_conv1d(x, p["w1"], p["b1"]))          # dropout = identity
    scale = p["bn_gamma"] / jnp.sqrt(p["bn_var"] + 1e-5)
    h = (h - p["bn_mean"][None, :, None]) * scale[None, :, None] \
        + p["bn_beta"][None, :, None]
    h = jax.nn.relu(_ref_conv1d(h, p["w2"], p["b2"]))
    h = jax.nn.relu(_ref_conv1d(h, p["w3"], p["b3"]))          # (N, 1, L)
    flat = h.reshape(h.shape[0], -1)
    return jnp.dot(flat, p["fc_w"].T,
                   precision=jax.lax.Precision.HIGHEST) + p["fc_b"][None, :]


if __name__ == "__main__":
    N, C, L = 16, 8, 128       # batch, out_channels, sequence length (= X_train.shape[1])
    key = jax.random.PRNGKey(0)
    keys = jax.random.split(key, 13)

    def unif(k, shape, bound):
        return jax.random.uniform(k, shape, jnp.float32, -bound, bound)

    K = 3
    params = {
        "w1": unif(keys[0], (C, 1, K), 1.0 / (1 * K) ** 0.5),
        "b1": unif(keys[1], (C,), 1.0 / (1 * K) ** 0.5),
        "w2": unif(keys[2], (C, C, K), 1.0 / (C * K) ** 0.5),
        "b2": unif(keys[3], (C,), 1.0 / (C * K) ** 0.5),
        "w3": unif(keys[4], (1, C, K), 1.0 / (C * K) ** 0.5),
        "b3": unif(keys[5], (1,), 1.0 / (C * K) ** 0.5),
        "fc_w": unif(keys[6], (1, L), 1.0 / L ** 0.5),
        "fc_b": unif(keys[7], (1,), 1.0 / L ** 0.5),
        "bn_gamma": jax.random.uniform(keys[8], (C,), jnp.float32, 0.5, 1.5),
        "bn_beta": unif(keys[9], (C,), 0.2),
        "bn_mean": unif(keys[10], (C,), 0.2),
        "bn_var": jax.random.uniform(keys[11], (C,), jnp.float32, 0.5, 1.5),
    }
    x = jax.random.normal(keys[12], (N, 1, L), jnp.float32)    # NCW input

    out = jax.block_until_ready(dnngp_forward(x, params))
    ref = dnngp_reference(x, params)
    assert out.shape == (N, 1), out.shape
    np.testing.assert_allclose(np.asarray(out), np.asarray(ref),
                               rtol=2e-2, atol=2e-2)
    print("KERNEL_OK")
</pallas_src>

<mosaic_0001>
module attributes {stable_mosaic.version = 11 : i64} {
  func.func @_dnngp_kernel(%arg0: i32, %arg1: memref<1x128xf32, #tpu.memory_space<vmem>>, %arg2: memref<1x128xf32, #tpu.memory_space<vmem>>, %arg3: memref<16x128xf32, #tpu.memory_space<vmem>>, %arg4: memref<128x48xbf16, #tpu.memory_space<vmem>>, %arg5: memref<128x1xf32, #tpu.memory_space<vmem>>, %arg6: memref<128x384xbf16, #tpu.memory_space<vmem>>, %arg7: memref<128x128xf32, #tpu.memory_space<vmem>>, %arg8: memref<16x384xbf16, #tpu.memory_space<vmem>>, %arg9: memref<8x128xf32, #tpu.memory_space<vmem>>, %arg10: memref<2xf32, #tpu.memory_space<smem>>, %arg11: memref<1x16xf32, #tpu.memory_space<vmem>>) attributes {dimension_semantics = [#tpu.dimension_semantics<parallel>], iteration_bounds = array<i64: 1>, scalar_prefetch = 0 : i64, scratch_operands = 0 : i64, tpu.core_type = #tpu.core_type<tc>, window_params = [{pipeline_mode = #tpu.pipeline_mode<synchronous>, transform_indices = @transform_0, window_bounds = array<i64: 1, 128>}, {pipeline_mode = #tpu.pipeline_mode<synchronous>, transform_indices = @transform_1, window_bounds = array<i64: 1, 128>}, {transform_indices = @transform_2, window_bounds = array<i64: 16, 128>}, {pipeline_mode = #tpu.pipeline_mode<synchronous>, transform_indices = @transform_3, window_bounds = array<i64: 128, 48>}, {pipeline_mode = #tpu.pipeline_mode<synchronous>, transform_indices = @transform_4, window_bounds = array<i64: 128, 1>}, {pipeline_mode = #tpu.pipeline_mode<synchronous>, transform_indices = @transform_5, window_bounds = array<i64: 128, 384>}, {pipeline_mode = #tpu.pipeline_mode<synchronous>, transform_indices = @transform_6, window_bounds = array<i64: 128, 128>}, {pipeline_mode = #tpu.pipeline_mode<synchronous>, transform_indices = @transform_7, window_bounds = array<i64: 16, 384>}, {pipeline_mode = #tpu.pipeline_mode<synchronous>, transform_indices = @transform_8, window_bounds = array<i64: 8, 128>}, {transform_indices = @transform_9, window_bounds = array<i64: 2>}, {transform_indices = @transform_10, window_bounds = array<i64: 1, 16>}]} {
    %c0 = arith.constant 0 : index
    %c0_0 = arith.constant 0 : index
    %0 = vector.load %arg3[%c0, %c0_0] : memref<16x128xf32, #tpu.memory_space<vmem>>, vector<16x128xf32>
    %c0_1 = arith.constant 0 : index
    %c0_2 = arith.constant 0 : index
    %1 = vector.load %arg1[%c0_1, %c0_2] : memref<1x128xf32, #tpu.memory_space<vmem>>, vector<1x128xf32>
    %c0_3 = arith.constant 0 : index
    %c0_4 = arith.constant 0 : index
    %2 = vector.load %arg2[%c0_3, %c0_4] : memref<1x128xf32, #tpu.memory_space<vmem>>, vector<1x128xf32>
    %c0_5 = arith.constant 0 : index
    %c0_6 = arith.constant 0 : index
    %3 = vector.load %arg4[%c0_5, %c0_6] : memref<128x48xbf16, #tpu.memory_space<vmem>>, vector<128x48xbf16>
    %4 = arith.truncf %0 : vector<16x128xf32> to vector<16x128xbf16>
    %c1_i32 = arith.constant 1 : i32
    %5 = tpu.dynamic_rotate %0 by %c1_i32 dim 1 : vector<16x128xf32>, i32 -> vector<16x128xf32>
    %6 = vector.broadcast %1 : vector<1x128xf32> to vector<16x128xf32>
    %7 = arith.mulf %5, %6 : vector<16x128xf32>
    %8 = arith.truncf %7 : vector<16x128xf32> to vector<16x128xbf16>
    %c127_i32 = arith.constant 127 : i32
    %9 = tpu.dynamic_rotate %0 by %c127_i32 dim 1 : vector<16x128xf32>, i32 -> vector<16x128xf32>
    %10 = vector.broadcast %2 : vector<1x128xf32> to vector<16x128xf32>
    %11 = arith.mulf %9, %10 : vector<16x128xf32>
    %12 = arith.truncf %11 : vector<16x128xf32> to vector<16x128xbf16>
    %13 = tpu.concatenate %8, %4, %12 in 0 : vector<16x128xbf16>, vector<16x128xbf16>, vector<16x128xbf16> -> vector<48x128xbf16>
    %cst = arith.constant dense<0.000000e+00> : vector<128x128xf32>
    %14 = tpu.matmul %3, %13, %cst {dimension_numbers = #tpu.dot_dimension_numbers<[1], [0], [0], [1], [0, 0, 1, 1], [], []>} : vector<128x48xbf16>, vector<48x128xbf16>, vector<128x128xf32> -> vector<128x128xf32>
    %c0_7 = arith.constant 0 : index
    %c0_8 = arith.constant 0 : index
    %15 = vector.load %arg5[%c0_7, %c0_8] : memref<128x1xf32, #tpu.memory_space<vmem>>, vector<128x1xf32>
    %16 = vector.broadcast %15 : vector<128x1xf32> to vector<128x128xf32>
    %17 = arith.addf %14, %16 : vector<128x128xf32>
    %cst_9 = arith.constant 0.000000e+00 : f32
    %18 = vector.broadcast %cst_9 : f32 to vector<128x128xf32>
    %19 = arith.maximumf %17, %18 : vector<128x128xf32>
    %c0_10 = arith.constant 0 : index
    %c0_11 = arith.constant 0 : index
    %20 = vector.load %arg6[%c0_10, %c0_11] : memref<128x384xbf16, #tpu.memory_space<vmem>>, vector<128x384xbf16>
    %21 = arith.truncf %19 : vector<128x128xf32> to vector<128x128xbf16>
    %c1_i32_12 = arith.constant 1 : i32
    %22 = tpu.dynamic_rotate %19 by %c1_i32_12 dim 1 : vector<128x128xf32>, i32 -> vector<128x128xf32>
    %23 = vector.broadcast %1 : vector<1x128xf32> to vector<128x128xf32>
    %24 = arith.mulf %22, %23 : vector<128x128xf32>
    %25 = arith.truncf %24 : vector<128x128xf32> to vector<128x128xbf16>
    %c127_i32_13 = arith.constant 127 : i32
    %26 = tpu.dynamic_rotate %19 by %c127_i32_13 dim 1 : vector<128x128xf32>, i32 -> vector<128x128xf32>
    %27 = vector.broadcast %2 : vector<1x128xf32> to vector<128x128xf32>
    %28 = arith.mulf %26, %27 : vector<128x128xf32>
    %29 = arith.truncf %28 : vector<128x128xf32> to vector<128x128xbf16>
    %30 = tpu.concatenate %25, %21, %29 in 0 : vector<128x128xbf16>, vector<128x128xbf16>, vector<128x128xbf16> -> vector<384x128xbf16>
    %cst_14 = arith.constant dense<0.000000e+00> : vector<128x128xf32>
    %31 = tpu.matmul %20, %30, %cst_14 {dimension_numbers = #tpu.dot_dimension_numbers<[1], [0], [0], [1], [0, 0, 1, 1], [], []>} : vector<128x384xbf16>, vector<384x128xbf16>, vector<128x128xf32> -> vector<128x128xf32>
    %c0_15 = arith.constant 0 : index
    %c0_16 = arith.constant 0 : index
    %32 = vector.load %arg7[%c0_15, %c0_16] : memref<128x128xf32, #tpu.memory_space<vmem>>, vector<128x128xf32>
    %33 = arith.addf %31, %32 : vector<128x128xf32>
    %cst_17 = arith.constant 0.000000e+00 : f32
    %34 = vector.broadcast %cst_17 : f32 to vector<128x128xf32>
    %35 = arith.maximumf %33, %34 : vector<128x128xf32>
    %c0_18 = arith.constant 0 : index
    %c0_19 = arith.constant 0 : index
    %36 = vector.load %arg8[%c0_18, %c0_19] : memref<16x384xbf16, #tpu.memory_space<vmem>>, vector<16x384xbf16>
    %37 = arith.truncf %35 : vector<128x128xf32> to vector<128x128xbf16>
    %c1_i32_20 = arith.constant 1 : i32
    %38 = tpu.dynamic_rotate %35 by %c1_i32_20 dim 1 : vector<128x128xf32>, i32 -> vector<128x128xf32>
    %39 = vector.broadcast %1 : vector<1x128xf32> to vector<128x128xf32>
    %40 = arith.mulf %38, %39 : vector<128x128xf32>
    %41 = arith.truncf %40 : vector<128x128xf32> to vector<128x128xbf16>
    %c127_i32_21 = arith.constant 127 : i32
    %42 = tpu.dynamic_rotate %35 by %c127_i32_21 dim 1 : vector<128x128xf32>, i32 -> vector<128x128xf32>
    %43 = vector.broadcast %2 : vector<1x128xf32> to vector<128x128xf32>
    %44 = arith.mulf %42, %43 : vector<128x128xf32>
    %45 = arith.truncf %44 : vector<128x128xf32> to vector<128x128xbf16>
    %46 = tpu.concatenate %41, %37, %45 in 0 : vector<128x128xbf16>, vector<128x128xbf16>, vector<128x128xbf16> -> vector<384x128xbf16>
    %cst_22 = arith.constant dense<0.000000e+00> : vector<16x128xf32>
    %47 = tpu.matmul %36, %46, %cst_22 {dimension_numbers = #tpu.dot_dimension_numbers<[1], [0], [0], [1], [0, 0, 1, 1], [], []>} : vector<16x384xbf16>, vector<384x128xbf16>, vector<16x128xf32> -> vector<16x128xf32>
    %c0_23 = arith.constant 0 : index
    %48 = memref.load %arg10[%c0_23] : memref<2xf32, #tpu.memory_space<smem>>
    %49 = vector.broadcast %48 : f32 to vector<16x128xf32>
    %50 = arith.addf %47, %49 : vector<16x128xf32>
    %cst_24 = arith.constant 0.000000e+00 : f32
    %51 = vector.broadcast %cst_24 : f32 to vector<16x128xf32>
    %52 = arith.maximumf %50, %51 : vector<16x128xf32>
    %c0_25 = arith.constant 0 : index
    %c0_26 = arith.constant 0 : index
    %53 = vector.load %arg9[%c0_25, %c0_26] : memref<8x128xf32, #tpu.memory_space<vmem>>, vector<8x128xf32>
    %cst_27 = arith.constant dense<0.000000e+00> : vector<8x16xf32>
    %54 = tpu.matmul %53, %52, %cst_27 {dimension_numbers = #tpu.dot_dimension_numbers<[1], [1], [0], [0], [0, 0, 1, 0], [], []>} : vector<8x128xf32>, vector<16x128xf32>, vector<8x16xf32> -> vector<8x16xf32>
    %55 = vector.extract_strided_slice %54 {offsets = [0, 0], sizes = [1, 16], strides = [1, 1]} : vector<8x16xf32> to vector<1x16xf32>
    %c1 = arith.constant 1 : index
    %56 = memref.load %arg10[%c1] : memref<2xf32, #tpu.memory_space<smem>>
    %57 = vector.broadcast %56 : f32 to vector<1x16xf32>
    %58 = arith.addf %55, %57 : vector<1x16xf32>
    %c0_28 = arith.constant 0 : index
    %c0_29 = arith.constant 0 : index
    %59 = vector.load %arg11[%c0_28, %c0_29] : memref<1x16xf32, #tpu.memory_space<vmem>>, vector<1x16xf32>
    tpu.vector_store %arg11[%c0_28, %c0_29], %58 {strides = array<i32>} : memref<1x16xf32, #tpu.memory_space<vmem>>, vector<1x16xf32>,
    return
  }
  func.func @transform_0(%arg0: i32) -> (i32, i32) {
    %c0_i32 = arith.constant 0 : i32
    %c0_i32_0 = arith.constant 0 : i32
    %c0_i32_1 = arith.constant 0 : i32
    return %c0_i32, %c0_i32_0 : i32, i32
  }
  func.func @transform_1(%arg0: i32) -> (i32, i32) {
    %c0_i32 = arith.constant 0 : i32
    %c0_i32_0 = arith.constant 0 : i32
    %c0_i32_1 = arith.constant 0 : i32
    return %c0_i32, %c0_i32_0 : i32, i32
  }
  func.func @transform_2(%arg0: i32) -> (i32, i32) {
    %c0_i32 = arith.constant 0 : i32
    %c0_i32_0 = arith.constant 0 : i32
    return %arg0, %c0_i32 : i32, i32
  }
  func.func @transform_3(%arg0: i32) -> (i32, i32) {
    %c0_i32 = arith.constant 0 : i32
    %c0_i32_0 = arith.constant 0 : i32
    %c0_i32_1 = arith.constant 0 : i32
    return %c0_i32, %c0_i32_0 : i32, i32
  }
  func.func @transform_4(%arg0: i32) -> (i32, i32) {
    %c0_i32 = arith.constant 0 : i32
    %c0_i32_0 = arith.constant 0 : i32
    %c0_i32_1 = arith.constant 0 : i32
    return %c0_i32, %c0_i32_0 : i32, i32
  }
  func.func @transform_5(%arg0: i32) -> (i32, i32) {
    %c0_i32 = arith.constant 0 : i32
    %c0_i32_0 = arith.constant 0 : i32
    %c0_i32_1 = arith.constant 0 : i32
    return %c0_i32, %c0_i32_0 : i32, i32
  }
  func.func @transform_6(%arg0: i32) -> (i32, i32) {
    %c0_i32 = arith.constant 0 : i32
    %c0_i32_0 = arith.constant 0 : i32
    %c0_i32_1 = arith.constant 0 : i32
    return %c0_i32, %c0_i32_0 : i32, i32
  }
  func.func @transform_7(%arg0: i32) -> (i32, i32) {
    %c0_i32 = arith.constant 0 : i32
    %c0_i32_0 = arith.constant 0 : i32
    %c0_i32_1 = arith.constant 0 : i32
    return %c0_i32, %c0_i32_0 : i32, i32
  }
  func.func @transform_8(%arg0: i32) -> (i32, i32) {
    %c0_i32 = arith.constant 0 : i32
    %c0_i32_0 = arith.constant 0 : i32
    %c0_i32_1 = arith.constant 0 : i32
    return %c0_i32, %c0_i32_0 : i32, i32
  }
  func.func @transform_9(%arg0: i32) -> i32 {
    %c0_i32 = arith.constant 0 : i32
    %c0_i32_0 = arith.constant 0 : i32
    return %c0_i32 : i32
  }
  func.func @transform_10(%arg0: i32) -> (i32, i32) {
    %c0_i32 = arith.constant 0 : i32
    %c0_i32_0 = arith.constant 0 : i32
    return %arg0, %c0_i32 : i32, i32
  }
}

</mosaic_0001>

<bundles_post_ra>
// kernel: tpu_custom_call.1
= control target key start
LH: loop header
LB: loop body
LE: loop exit
PB: predicated region body
PF: predicated region fallthrough
CT: control target
= control target key end

     0   :  { %15 = vsyncpa [#allocation3], 0  ;;  %s2209_s0 = inlined_call_operand.vmem [shape: f32[1,128], index: 0, kind: input, shape index: {}]   ;;  %s2210_s1 = inlined_call_operand.vmem [shape: f32[1,128], index: 1, kind: input, shape index: {}]   ;;  %s2211_s2 = inlined_call_operand.hbm [shape: f32[16,128], index: 2, kind: input, shape index: {}]   ;;  %s2212_s3 = inlined_call_operand.vmem [shape: bf16[128,48], index: 3, kind: input, shape index: {}]   ;;  %s2213_s4 = inlined_call_operand.vmem [shape: f32[128,1], index: 4, kind: input, shape index: {}]   ;;  %s2214_s5 = inlined_call_operand.vmem [shape: bf16[128,384], index: 5, kind: input, shape index: {}]   ;;  %s2215_s6 = inlined_call_operand.hbm [shape: f32[128,128], index: 6, kind: input, shape index: {}]   ;;  %s2216_s7 = inlined_call_operand.vmem [shape: bf16[16,384], index: 7, kind: input, shape index: {}]   ;;  %s2217_s8 = inlined_call_operand.vmem [shape: f32[8,128], index: 8, kind: input, shape index: {}]   ;;  %s2218_s9 = inlined_call_operand.vmem [shape: f32[2], index: 9, kind: input, shape index: {}]   ;;  %s2219_s10 = inlined_call_operand.hbm [shape: f32[1,16], index: 10, kind: output, shape index: {}]  }
   0x1   :  { %16 = vsyncpa [#allocation7], 0 }
   0x2   :  { %17 = vsyncpa [#allocation5], 0 }
   0x3   :  { %18 = vsyncpa [#allocation4], 0  ;;  %s1615_s13 = smov [#allocation2]  }
   0x4   :  { %s28_s14 = sshll.u32 %s1615_s13, 4  ;;  %s29_s14 = int_to_ptr.vmem [resolvable:$true] %s28_s14 }
   0x5   :  { %s1543_s15 = scalar_lea.vmem %s29_s14, 256  ;;  %p1548_p1 = scmp.lt.s32.totalorder %s29_s14, %s29_s14 }
   0x6   :  { %p1544_p0 = scmp.ne.s32.totalorder %s29_s14, %s1543_s15  ;;  %p1549_p2 = scmp.lt.s32.totalorder %s1543_s15, %s1543_s15 }
   0x8   :  { %p1550_p3 = por %p1549_p2, %p1548_p1 }
   0xa   :  { %p1551_p4 = pnand %p1550_p3, %p1544_p0 }
   0xc   :  { %1554 = shalt.err (!%p1551_p4)
}
   0xd   :  { %s1616_s16 = smov 128   ;;  %s1617_s17 = smov 8  }
   0xe   :  { %34 = dma.hbm_to_vmem [thread:$0]  %s2211_s2, 256, %s29_s14, [#allocation3], %s1616_s16, %s1616_s16, %s1617_s17  }
   0xf   :  { %s1618_s20 = smov [#allocation6]   ;;  %s63_s24 = sshll.u32 %s2218_s9, 4  ;;  %s64_s24 = int_to_ptr.vmem [resolvable:$true] %s63_s24 }
  0x10   :  { %s46_s21 = sshll.u32 %s1618_s20, 4  ;;  %s47_s21 = int_to_ptr.vmem [resolvable:$true] %s46_s21 }
  0x11   :  { %s1563_s25 = scalar_lea.vmem %s47_s21, 2048  ;;  %p1568_p6 = scmp.lt.s32.totalorder %s47_s21, %s47_s21 }
  0x12   :  { %p1564_p5 = scmp.ne.s32.totalorder %s47_s21, %s1563_s25  ;;  %p1569_p7 = scmp.lt.s32.totalorder %s1563_s25, %s1563_s25 }
  0x14   :  { %p1570_p8 = por %p1569_p7, %p1568_p6 }
  0x16   :  { %p1571_p9 = pnand %p1570_p8, %p1564_p5 }
  0x18   :  { %1574 = shalt.err (!%p1571_p9)
}
  0x19   :  { %52 = dma.hbm_to_vmem [thread:$0]  %s2215_s6, 2048, %s47_s21, [#allocation7], %s1616_s16, %s1616_s16, %s1617_s17  }
  0x1a   :  { %s1575_s2 = scalar_lea.vmem %s64_s24, 16  ;;  %p1580_p11 = scmp.lt.s32.totalorder %s64_s24, %s64_s24 }
  0x1b   :  { %p1576_p10 = scmp.ne.s32.totalorder %s64_s24, %s1575_s2  ;;  %p1581_p12 = scmp.lt.s32.totalorder %s1575_s2, %s1575_s2 }
  0x1d   :  { %p1582_p13 = por %p1581_p12, %p1580_p11 }
  0x1f   :  { %p1583_p0 = pnand %p1582_p13, %p1576_p10 }
  0x21   :  { %1586 = shalt.err (!%p1583_p0)
}
  0x22   :  { %s1619_s9 = smov [#allocation8]  }
  0x23   :  { %66 = dma.vmem_to_smem %s64_s24, 16, %s1619_s9, [#allocation5]  }
  0x24   :  { %1607 = dma.done.wait [#allocation3], 256  }
  0x25   :  { %1608 = vsyncadd [#allocation3], 4294967040 }
  0x26   :  { %1609 = dma.done.wait [#allocation7], 2048  }
  0x27   :  { %1610 = vsyncadd [#allocation7], 4294965248 }
  0x28   :  { %1611 = dma.done.wait [#allocation5], 16  }
  0x29   :  { %1612 = vsyncadd [#allocation5], 4294967280 }
  0x2a   :  { %76 = sfence }
  0x2b   :  { %v78_v0 = vld [vmem:[#allocation2] sm:$0xff]  ;;  %v79_v1 = vld [vmem:[#allocation2 + $0x8] sm:$0xff]  ;;  %s1620_s28 = smov 127   ;;  %s1621_s6 = smov 1   ;;  %vm261_vm0 = vcmask 392192   ;;  %v140_v4 = vld [vmem:[%s2213_s4 + $0x78] sm:$0xff] }
  0x2c   :  { %112 = vrot.lane.b32.xlu0 %v78_v0, %s1620_s28  ;;  %99 = vrot.lane.b32.xlu1 %v78_v0, %s1621_s6  ;;  %v98_v2 = vpack.c.bf16 %v79_v1, %v78_v0  ;;  %v1489_v3 = vld [vmem:[%s2212_s3] sm:$0xff]   ;;  %v139_v5 = vld [vmem:[%s2213_s4 + $0x70] sm:$0xff]  ;;  %v1622_v6 = vmov 0   ;;  %vm1624_vm1 = vmmov 0   ;;  %s1029_s24 = sld [smem:[#allocation8]]  ;;  %s1625_s26 = smov [#allocation9]  }
  0x2d   :  { %1401 = vmatprep.mubr.msk.bf16.mxu0 %vm261_vm0, %v1489_v3  ;;  %1488 = vset.pattern.permute.xlu1 %v1622_v6  ;;  %v137_v7 = vld [vmem:[%s2213_s4 + $0x60] sm:$0xff]  ;;  %v138_v8 = vld [vmem:[%s2213_s4 + $0x68] sm:$0xff]  ;;  %v135_v9 = vld [vmem:[%s2213_s4 + $0x50] sm:$0xff]  ;;  %s1213_s27 = sshll.u32 %s1625_s26, 4  ;;  %vm1205_vm2 = vcmask 122880   ;;  %s1214_s27 = int_to_ptr.vmem [resolvable:$true] %s1213_s27 }
  0x2e   :  { %1487 = vset.pattern.permute.xlu0 %v1622_v6  ;;  %v136_v10 = vld [vmem:[%s2213_s4 + $0x58] sm:$0xff]  ;;  %v133_v11 = vld [vmem:[%s2213_s4 + $0x40] sm:$0xff]  ;;  %v134_v12 = vld [vmem:[%s2213_s4 + $0x48] sm:$0xff]  ;;  %s1587_s2 = scalar_lea.vmem %s1214_s27, 16  ;;  %s1591_s9 = scalar_lea.vmem %s1214_s27, 32 }
  0x2f   :  { %v131_v13 = vld [vmem:[%s2213_s4 + $0x30] sm:$0xff]  ;;  %v132_v14 = vld [vmem:[%s2213_s4 + $0x38] sm:$0xff]  ;;  %v129_v15 = vld [vmem:[%s2213_s4 + $0x20] sm:$0xff]  ;;  %p1588_p1 = scmp.ne.s32.totalorder %s1214_s27, %s1587_s2  ;;  %p1592_p2 = scmp.lt.s32.totalorder %s1214_s27, %s1214_s27 }
  0x30   :  { %114 = vrot.lane.b32.xlu0 %v79_v1, %s1620_s28  ;;  %101 = vrot.lane.b32.xlu1 %v79_v1, %s1621_s6  ;;  %v130_v16 = vld [vmem:[%s2213_s4 + $0x28] sm:$0xff]  ;;  %v127_v17 = vld [vmem:[%s2213_s4 + $0x10] sm:$0xff]  ;;  %p1593_p3 = scmp.lt.s32.totalorder %s1591_s9, %s1587_s2 }
  0x31   :  { %v128_v18 = vld [vmem:[%s2213_s4 + $0x18] sm:$0xff]  ;;  %v125_v19 = vld [vmem:[%s2213_s4] sm:$0xff]  ;;  %v126_v20 = vld [vmem:[%s2213_s4 + $0x8] sm:$0xff]  ;;  %s1269_s4 = sld [smem:[#allocation8 + $0x1]] }
  0x32   :  { %v1749_v23 = vld [vmem:[%s2210_s1] ss:$0 sm:$0xff]  ;;  %v1490_v33 = vld [vmem:[%s2212_s3 + $0x8] sm:$0xff]   ;;  %v1491_v34 = vld [vmem:[%s2212_s3 + $0x10] sm:$0xff]   ;;  %p1594_p4 = por %p1593_p3, %p1592_p2 }
  0x33   :  { %v1756_v27 = vld [vmem:[%s2209_s0] ss:$0 sm:$0xff]  ;;  %v1492_v35 = vld [vmem:[%s2212_s3 + $0x18] sm:$0xff]   ;;  %v1494_v37 = vld [vmem:[%s2212_s3 + $0x28] sm:$0xff]  }
  0x34   :  { %218 = vperm.xlu1 %1488, %v140_v4   ;;  %213 = vperm.xlu0 %1487, %v139_v5   ;;  %v1493_v36 = vld [vmem:[%s2212_s3 + $0x20] sm:$0xff]   ;;  %v1495_v38 = vld [vmem:[%s2212_s3 + $0x30] sm:$0xff]   ;;  %v1496_v39 = vld [vmem:[%s2212_s3 + $0x38] sm:$0xff]   ;;  %p1595_p5 = pnand %p1594_p4, %p1588_p1 }
  0x38   :  { %203 = vperm.xlu1 %1488, %v137_v7   ;;  %208 = vperm.xlu0 %1487, %v138_v8  }
  0x3c   :  { %193 = vperm.xlu1 %1488, %v135_v9   ;;  %198 = vperm.xlu0 %1487, %v136_v10  }
  0x40   :  { %183 = vperm.xlu1 %1488, %v133_v11   ;;  %188 = vperm.xlu0 %1487, %v134_v12  }
  0x44   :  { %173 = vperm.xlu1 %1488, %v131_v13   ;;  %178 = vperm.xlu0 %1487, %v132_v14  }
  0x48   :  { %163 = vperm.xlu1 %1488, %v129_v15   ;;  %168 = vperm.xlu0 %1487, %v130_v16  }
  0x4c   :  { %153 = vperm.xlu1 %1488, %v127_v17   ;;  %158 = vperm.xlu0 %1487, %v128_v18  }
  0x50   :  { %143 = vperm.xlu1 %1488, %v125_v19   ;;  %148 = vperm.xlu0 %1487, %v126_v20  }
  0x9e   :  { %v113_v21 = vpop.permute.xlu0 %112  ;;  %v100_v22 = vpop.permute.xlu1 %99 }
  0x9f   :  { %v122_v25 = vmul.f32 %v1749_v23, %v113_v21  ;;  %v109_v30 = vmul.f32 %v1756_v27, %v100_v22 }
  0xa2   :  { %v115_v24 = vpop.permute.xlu0 %114  ;;  %v102_v28 = vpop.permute.xlu1 %101 }
  0xa3   :  { %v123_v26 = vmul.f32 %v1749_v23, %v115_v24  ;;  %v110_v31 = vmul.f32 %v1756_v27, %v102_v28 }
  0xa5   :  { %v124_v29 = vpack.c.bf16 %v123_v26, %v122_v25  ;;  %v111_v32 = vpack.c.bf16 %v110_v31, %v109_v30 }
  0xa7   :  { %1395 = vmatprep.subr.bf16.mxu0 %v124_v29 }
  0xa8   :  { %1396 = vmatpush3.bf16.msra.mxu0 %v124_v29 }
  0xa9   :  { %1397 = vmatprep.subr.bf16.mxu0 %v98_v2 }
  0xac   :  { %1398 = vmatpush3.bf16.msra.mxu0 %v98_v2 }
  0xad   :  { %1399 = vmatprep.subr.bf16.mxu0 %v111_v32 }
  0xaf   :  { %v219_v40 = vpop.permute.xlu1 %218  ;;  %v214_v41 = vpop.permute.xlu0 %213 }
  0xb0   :  { %1400 = vmatpush3.bf16.msra.mxu0 %v111_v32 }
  0xb3   :  { %1402 = vmatmul.mubr.msk.bf16.vlgmr.msra.gmra.mxu0 %vm261_vm0, %v1490_v33  ;;  %v204_v42 = vpop.permute.xlu1 %203  ;;  %v209_v43 = vpop.permute.xlu0 %208 }
  0xb4   :  { %1405 = vmatprep.mubr.msk.bf16.mxu0 %vm261_vm0, %v1491_v34 }
  0xb7   :  { %v194_v44 = vpop.permute.xlu1 %193  ;;  %v199_v45 = vpop.permute.xlu0 %198 }
  0xbb   :  { %1406 = vmatmul.mubr.msk.bf16.gmra.mxu0 %vm261_vm0, %v1492_v35  ;;  %v184_v48 = vpop.permute.xlu1 %183  ;;  %v189_v50 = vpop.permute.xlu0 %188 }
  0xbc   :  { %1409 = vmatprep.mubr.msk.bf16.mxu0 %vm261_vm0, %v1493_v36 }
  0xbf   :  { %v174_v53 = vpop.permute.xlu1 %173  ;;  %v179_v56 = vpop.permute.xlu0 %178 }
  0xc3   :  { %1410 = vmatmul.mubr.msk.bf16.gmra.mxu0 %vm261_vm0, %v1494_v37  ;;  %v164_v29 = vpop.permute.xlu1 %163  ;;  %v169_v30 = vpop.permute.xlu0 %168 }
  0xc4   :  { %1413 = vmatprep.mubr.msk.bf16.mxu0 %vm261_vm0, %v1495_v38 }
  0xc7   :  { %v154_v31 = vpop.permute.xlu1 %153  ;;  %v159_v33 = vpop.permute.xlu0 %158 }
  0xcb   :  { %1414 = vmatmul.mubr.msk.bf16.gmra.mxu0 %vm261_vm0, %v1496_v39  ;;  %v144_v37 = vpop.permute.xlu1 %143 }
 0x173   :  { %v1403_v46 = vpop.f32.mrf.mxu0 }
 0x174   :  { %v329_v34 = vadd.f32 %v1403_v46, %v154_v31 }
 0x175   :  { %v1788_v47 = vpop.f32.mrf.mxu0 }
 0x176   :  { %v1840_v38 = vmax.f32 %v329_v34, 0.0  ;;  %v321_v39 = vadd.f32 %v1788_v47, %v144_v37 }
 0x177   :  { %v1790_v49 = vpop.f32.mrf.mxu0 }
 0x179   :  { %v1792_v51 = vpop.f32.mrf.mxu0 }
 0x17b   :  { %v1407_v52 = vpop.f32.mrf.mxu0 }
 0x17c   :  { %v345_v55 = vadd.f32 %v1407_v52, %v174_v53 }
 0x17d   :  { %v336_v54 = vpop.f32.mrf.mxu0 }
 0x17e   :  { %v1794_v60 = vmax.f32 %v345_v55, 0.0  ;;  %v337_v32 = vadd.f32 %v336_v54, %v164_v29 }
 0x17f   :  { %v1408_v57 = vpop.f32.mrf.mxu0 }
 0x180   :  { %v348_v58 = vadd.f32 %v1408_v57, %v179_v56  ;;  %v1834_v35 = vmax.f32 %v337_v32, 0.0 }
 0x181   :  { %v339_v59 = vpop.f32.mrf.mxu0 }
 0x182   :  { %v1796_v61 = vmax.f32 %v348_v58, 0.0  ;;  %v340_v36 = vadd.f32 %v339_v59, %v169_v30 }
 0x183   :  { %v1411_v62 = vpop.f32.mrf.mxu0 }
 0x184   :  { %v434_v63 = vpack.c.bf16 %v1796_v61, %v1794_v60  ;;  %v361_v1 = vadd.f32 %v1411_v62, %v194_v44  ;;  %v1853_v44 = vmax.f32 %v321_v39, 0.0 }
 0x185   :  { %v352_v0 = vpop.f32.mrf.mxu0 }
 0x186   :  { %v353_v3 = vadd.f32 %v352_v0, %v184_v48  ;;  %v1800_v6 = vmax.f32 %v361_v1, 0.0  ;;  %v1512_v48 = vld [vmem:[%s2214_s5 + $0x8] ss:$12 sps:$4 sm:$0xff]  }
 0x187   :  { %v1412_v2 = vpop.f32.mrf.mxu0  ;;  %1433 = vmatprep.mubr.bf16.mxu0 %v1512_v48  ;;  %v1503_v48 = vld [vmem:[%s2214_s5 + $0x34] ss:$12 sps:$4 sm:$0xff]  }
 0x188   :  { %v364_v4 = vadd.f32 %v1412_v2, %v199_v45  ;;  %v1804_v10 = vmax.f32 %v353_v3, 0.0 }
 0x189   :  { %v355_v5 = vpop.f32.mrf.mxu0 }
 0x18a   :  { %v1802_v7 = vmax.f32 %v364_v4, 0.0  ;;  %v356_v8 = vadd.f32 %v355_v5, %v189_v50 }
 0x18b   :  { %v1415_v9 = vpop.f32.mrf.mxu0 }
 0x18c   :  { %v1806_v11 = vmax.f32 %v356_v8, 0.0  ;;  %v377_v12 = vadd.f32 %v1415_v9, %v214_v41  ;;  %v436_v13 = vpack.c.bf16 %v1802_v7, %v1800_v6  ;;  %v1844_v41 = vmax.f32 %v340_v36, 0.0  ;;  %v1500_v36 = vld [vmem:[%s2214_s5 + $0x1c] ss:$12 sps:$4 sm:$0xff]  }
 0x18d   :  { %v368_v14 = vpop.f32.mrf.mxu0 }
 0x18e   :  { %v397_v15 = vmax.f32 %v377_v12, 0.0  ;;  %v369_v16 = vadd.f32 %v368_v14, %v204_v42  ;;  %v435_v17 = vpack.c.bf16 %v1806_v11, %v1804_v10  ;;  %v149_v42 = vpop.permute.xlu0 %148 }
 0x18f   :  { %v1416_v18 = vpop.f32.mrf.mxu0  ;;  %v324_v46 = vadd.f32 %v1792_v51, %v149_v42 }
 0x190   :  { %v380_v19 = vadd.f32 %v1416_v18, %v219_v40  ;;  %467 = vrot.lane.b32.xlu1 %v397_v15, %s1621_s6  ;;  %v1813_v21 = vmax.f32 %v369_v16, 0.0  ;;  %v332_v40 = vadd.f32 %v1790_v49, %v159_v33  ;;  %v1497_v33 = vld [vmem:[%s2214_s5] ss:$12 sps:$4 sm:$0xff]  }
 0x191   :  { %v371_v20 = vpop.f32.mrf.mxu0  ;;  %v1862_v47 = vmax.f32 %v324_v46, 0.0 }
 0x192   :  { %v398_v22 = vmax.f32 %v380_v19, 0.0  ;;  %v372_v24 = vadd.f32 %v371_v20, %v209_v43  ;;  %v1499_v43 = vld [vmem:[%s2214_s5 + $0x4] ss:$12 sps:$4 sm:$0xff]   ;;  %v1855_v45 = vmax.f32 %v332_v40, 0.0  ;;  %v433_v19 = vpack.c.bf16 %v1844_v41, %v1834_v35 }
 0x193   :  { %727 = vmatprep.mubr.bf16.mxu1 %v1499_v43 }
 0x194   :  { %v1815_v25 = vmax.f32 %v372_v24, 0.0  ;;  %469 = vrot.lane.b32.xlu0 %v398_v22, %s1621_s6  ;;  %463 = vrot.lane.b32.xlu1 %v1813_v21, %s1621_s6  ;;  %v438_v26 = vpack.c.bf16 %v398_v22, %v397_v15 }
 0x196   :  { %1281 = vmatprep.subr.bf16.mxu1 %v438_v26  ;;  %v437_v28 = vpack.c.bf16 %v1815_v25, %v1813_v21  ;;  %v431_v26 = vpack.c.bf16 %v1862_v47, %v1853_v44 }
 0x198   :  { %465 = vrot.lane.b32.xlu0 %v1815_v25, %s1621_s6  ;;  %459 = vrot.lane.b32.xlu1 %v1800_v6, %s1621_s6 }
 0x19c   :  { %461 = vrot.lane.b32.xlu0 %v1802_v7, %s1621_s6  ;;  %455 = vrot.lane.b32.xlu1 %v1804_v10, %s1621_s6 }
 0x1a0   :  { %457 = vrot.lane.b32.xlu0 %v1806_v11, %s1621_s6  ;;  %451 = vrot.lane.b32.xlu1 %v1794_v60, %s1621_s6 }
 0x1a4   :  { %453 = vrot.lane.b32.xlu0 %v1796_v61, %s1621_s6  ;;  %447 = vrot.lane.b32.xlu1 %v1834_v35, %s1621_s6 }
 0x1a8   :  { %449 = vrot.lane.b32.xlu0 %v1844_v41, %s1621_s6  ;;  %443 = vrot.lane.b32.xlu1 %v1840_v38, %s1621_s6 }
 0x1ac   :  { %445 = vrot.lane.b32.xlu0 %v1855_v45, %s1621_s6  ;;  %439 = vrot.lane.b32.xlu1 %v1853_v44, %s1621_s6 }
 0x1b0   :  { %441 = vrot.lane.b32.xlu0 %v1862_v47, %s1621_s6  ;;  %523 = vrot.lane.b32.xlu1 %v397_v15, %s1620_s28 }
 0x1b4   :  { %525 = vrot.lane.b32.xlu0 %v398_v22, %s1620_s28  ;;  %519 = vrot.lane.b32.xlu1 %v1813_v21, %s1620_s28  ;;  %v432_v22 = vpack.c.bf16 %v1855_v45, %v1840_v38 }
 0x1b8   :  { %521 = vrot.lane.b32.xlu0 %v1815_v25, %s1620_s28  ;;  %515 = vrot.lane.b32.xlu1 %v1800_v6, %s1620_s28 }
 0x1bc   :  { %517 = vrot.lane.b32.xlu0 %v1802_v7, %s1620_s28  ;;  %511 = vrot.lane.b32.xlu1 %v1804_v10, %s1620_s28 }
 0x1c0   :  { %513 = vrot.lane.b32.xlu0 %v1806_v11, %s1620_s28  ;;  %507 = vrot.lane.b32.xlu1 %v1794_v60, %s1620_s28 }
 0x1c4   :  { %509 = vrot.lane.b32.xlu0 %v1796_v61, %s1620_s28  ;;  %503 = vrot.lane.b32.xlu1 %v1834_v35, %s1620_s28 }
 0x1c8   :  { %505 = vrot.lane.b32.xlu0 %v1844_v41, %s1620_s28  ;;  %499 = vrot.lane.b32.xlu1 %v1840_v38, %s1620_s28 }
 0x1cc   :  { %501 = vrot.lane.b32.xlu0 %v1855_v45, %s1620_s28  ;;  %495 = vrot.lane.b32.xlu1 %v1853_v44, %s1620_s28  ;;  %v1502_v45 = vld [vmem:[%s2214_s5 + $0x18] ss:$12 sps:$4 sm:$0xff]  }
 0x1d0   :  { %497 = vrot.lane.b32.xlu0 %v1862_v47, %s1620_s28 }
 0x202   :  { %v468_v49 = vpop.permute.xlu1 %467 }
 0x203   :  { %v485_v52 = vmul.f32 %v1756_v27, %v468_v49 }
 0x206   :  { %v470_v50 = vpop.permute.xlu0 %469  ;;  %v464_v51 = vpop.permute.xlu1 %463 }
 0x207   :  { %v486_v53 = vmul.f32 %v1756_v27, %v470_v50  ;;  %v483_v57 = vmul.f32 %v1756_v27, %v464_v51 }
 0x209   :  { %v494_v54 = vpack.c.bf16 %v486_v53, %v485_v52 }
 0x20a   :  { %v466_v55 = vpop.permute.xlu0 %465  ;;  %v460_v56 = vpop.permute.xlu1 %459 }
 0x20b   :  { %v484_v58 = vmul.f32 %v1756_v27, %v466_v55  ;;  %1282 = vmatpush3.bf16.msra.mxu1 %v494_v54  ;;  %v481_v1 = vmul.f32 %v1756_v27, %v460_v56 }
 0x20c   :  { %1283 = vmatprep.subr.bf16.mxu1 %v437_v28 }
 0x20d   :  { %v493_v59 = vpack.c.bf16 %v484_v58, %v483_v57  ;;  %v1505_v57 = vld [vmem:[%s2214_s5 + $0x30] ss:$12 sps:$4 sm:$0xff]  }
 0x20e   :  { %v462_v62 = vpop.permute.xlu0 %461  ;;  %v456_v0 = vpop.permute.xlu1 %455 }
 0x20f   :  { %v482_v2 = vmul.f32 %v1756_v27, %v462_v62  ;;  %1284 = vmatpush3.bf16.msra.mxu1 %v493_v59  ;;  %v479_v8 = vmul.f32 %v1756_v27, %v456_v0  ;;  %v1506_v62 = vld [vmem:[%s2214_s5 + $0x4c] ss:$12 sps:$4 sm:$0xff]  }
 0x210   :  { %1285 = vmatprep.subr.bf16.mxu1 %v436_v13 }
 0x211   :  { %v492_v3 = vpack.c.bf16 %v482_v2, %v481_v1 }
 0x212   :  { %v458_v4 = vpop.permute.xlu0 %457  ;;  %v452_v5 = vpop.permute.xlu1 %451 }
 0x213   :  { %v480_v9 = vmul.f32 %v1756_v27, %v458_v4  ;;  %1286 = vmatpush3.bf16.msra.mxu1 %v492_v3  ;;  %v477_v16 = vmul.f32 %v1756_v27, %v452_v5 }
 0x214   :  { %1287 = vmatprep.subr.bf16.mxu1 %v435_v17 }
 0x215   :  { %v491_v12 = vpack.c.bf16 %v480_v9, %v479_v8  ;;  %v1508_v9 = vld [vmem:[%s2214_s5 + $0x48] ss:$12 sps:$4 sm:$0xff]  }
 0x216   :  { %v454_v14 = vpop.permute.xlu0 %453  ;;  %v448_v15 = vpop.permute.xlu1 %447 }
 0x217   :  { %v478_v6 = vmul.f32 %v1756_v27, %v454_v14  ;;  %1288 = vmatpush3.bf16.msra.mxu1 %v491_v12  ;;  %v475_v10 = vmul.f32 %v1756_v27, %v448_v15  ;;  %v1509_v15 = vld [vmem:[%s2214_s5 + $0x64] ss:$12 sps:$4 sm:$0xff]  }
 0x218   :  { %1289 = vmatprep.subr.bf16.mxu1 %v434_v63 }
 0x219   :  { %v490_v7 = vpack.c.bf16 %v478_v6, %v477_v16 }
 0x21a   :  { %v450_v13 = vpop.permute.xlu0 %449  ;;  %v444_v18 = vpop.permute.xlu1 %443 }
 0x21b   :  { %v476_v11 = vmul.f32 %v1756_v27, %v450_v13  ;;  %1290 = vmatpush3.bf16.msra.mxu1 %v490_v7  ;;  %v473_v60 = vmul.f32 %v1756_v27, %v444_v18 }
 0x21c   :  { %1291 = vmatprep.subr.bf16.mxu1 %v433_v19 }
 0x21d   :  { %v489_v17 = vpack.c.bf16 %v476_v11, %v475_v10  ;;  %v1511_v10 = vld [vmem:[%s2214_s5 + $0x60] ss:$12 sps:$4 sm:$0xff]  }
 0x21e   :  { %v446_v20 = vpop.permute.xlu0 %445  ;;  %v440_v21 = vpop.permute.xlu1 %439  ;;  %v1513_v11 = vld [vmem:[%s2214_s5 + $0x20] ss:$12 sps:$4 sm:$0xff]  }
 0x21f   :  { %v474_v61 = vmul.f32 %v1756_v27, %v446_v20  ;;  %1292 = vmatpush3.bf16.msra.mxu1 %v489_v17  ;;  %v471_v28 = vmul.f32 %v1756_v27, %v440_v21  ;;  %v1514_v17 = vld [vmem:[%s2214_s5 + $0x7c] ss:$12 sps:$4 sm:$0xff]   ;;  %v1517_v20 = vld [vmem:[%s2214_s5 + $0x38] ss:$12 sps:$4 sm:$0xff]  }
 0x220   :  { %1293 = vmatprep.subr.bf16.mxu1 %v432_v22  ;;  %v1516_v21 = vld [vmem:[%s2214_s5 + $0x78] ss:$12 sps:$4 sm:$0xff]   ;;  %v1518_v22 = vld [vmem:[%s2214_s5 + $0x50] ss:$12 sps:$4 sm:$0xff]  }
 0x221   :  { %v488_v63 = vpack.c.bf16 %v474_v61, %v473_v60  ;;  %v1519_v60 = vld [vmem:[%s2214_s5 + $0x94] ss:$12 sps:$4 sm:$0xff]  }
 0x222   :  { %v442_v24 = vpop.permute.xlu0 %441  ;;  %v524_v25 = vpop.permute.xlu1 %523  ;;  %v1522_v61 = vld [vmem:[%s2214_s5 + $0x68] ss:$12 sps:$4 sm:$0xff]  }
 0x223   :  { %v472_v29 = vmul.f32 %v1756_v27, %v442_v24  ;;  %1294 = vmatpush3.bf16.msra.mxu1 %v488_v63  ;;  %v541_v34 = vmul.f32 %v1749_v23, %v524_v25  ;;  %v1521_v63 = vld [vmem:[%s2214_s5 + $0x90] ss:$12 sps:$4 sm:$0xff]   ;;  %v1523_v24 = vld [vmem:[%s2214_s5 + $0x80] ss:$12 sps:$4 sm:$0xff]  }
 0x224   :  { %1295 = vmatprep.subr.bf16.mxu1 %v431_v26  ;;  %v1524_v25 = vld [vmem:[%s2214_s5 + $0xac] ss:$12 sps:$4 sm:$0xff]  }
 0x225   :  { %v487_v30 = vpack.c.bf16 %v472_v29, %v471_v28  ;;  %v1527_v26 = vld [vmem:[%s2214_s5 + $0x98] ss:$12 sps:$4 sm:$0xff]   ;;  %v1526_v28 = vld [vmem:[%s2214_s5 + $0xa8] ss:$12 sps:$4 sm:$0xff]   ;;  %v1528_v29 = vld [vmem:[%s2214_s5 + $0xb0] ss:$12 sps:$4 sm:$0xff]  }
 0x226   :  { %v526_v31 = vpop.permute.xlu0 %525  ;;  %v520_v32 = vpop.permute.xlu1 %519 }
 0x227   :  { %v542_v35 = vmul.f32 %v1749_v23, %v526_v31  ;;  %1296 = vmatpush3.bf16.msra.mxu1 %v487_v30  ;;  %v539_v40 = vmul.f32 %v1749_v23, %v520_v32 }
 0x229   :  { %v550_v37 = vpack.c.bf16 %v542_v35, %v541_v34 }
 0x22a   :  { %v522_v38 = vpop.permute.xlu0 %521  ;;  %v516_v39 = vpop.permute.xlu1 %515  ;;  %728 = vmatmul.mubr.bf16.vlgmr.msra.gmra.mxu1 %v1497_v33 }
 0x22b   :  { %v540_v41 = vmul.f32 %v1749_v23, %v522_v38  ;;  %1417 = vmatprep.subr.bf16.mxu0 %v550_v37  ;;  %735 = vmatprep.mubr.bf16.mxu1 %v1500_v36  ;;  %v537_v46 = vmul.f32 %v1749_v23, %v516_v39 }
 0x22c   :  { %1418 = vmatpush3.bf16.msra.mxu0 %v550_v37 }
 0x22d   :  { %v549_v42 = vpack.c.bf16 %v540_v41, %v539_v40 }
 0x22e   :  { %v518_v43 = vpop.permute.xlu0 %517  ;;  %v512_v44 = vpop.permute.xlu1 %511 }
 0x22f   :  { %v538_v47 = vmul.f32 %v1749_v23, %v518_v43  ;;  %1419 = vmatprep.subr.bf16.mxu0 %v549_v42  ;;  %v535_v52 = vmul.f32 %v1749_v23, %v512_v44 }
 0x230   :  { %1420 = vmatpush3.bf16.msra.mxu0 %v549_v42 }
 0x231   :  { %v548_v49 = vpack.c.bf16 %v538_v47, %v537_v46 }
 0x232   :  { %v514_v50 = vpop.permute.xlu0 %513  ;;  %v508_v51 = vpop.permute.xlu1 %507  ;;  %736 = vmatmul.mubr.bf16.gmra.mxu1 %v1502_v45 }
 0x233   :  { %v536_v53 = vmul.f32 %v1749_v23, %v514_v50  ;;  %1421 = vmatprep.subr.bf16.mxu0 %v548_v49  ;;  %743 = vmatprep.mubr.bf16.mxu1 %v1503_v48  ;;  %v533_v58 = vmul.f32 %v1749_v23, %v508_v51  ;;  %v551_v50 = vld [vmem:[#allocation6] sm:$0xff] }
 0x234   :  { %1422 = vmatpush3.bf16.msra.mxu0 %v548_v49 }
 0x235   :  { %v547_v54 = vpack.c.bf16 %v536_v53, %v535_v52 }
 0x236   :  { %v510_v55 = vpop.permute.xlu0 %509  ;;  %v504_v56 = vpop.permute.xlu1 %503 }
 0x237   :  { %v534_v59 = vmul.f32 %v1749_v23, %v510_v55  ;;  %1423 = vmatprep.subr.bf16.mxu0 %v547_v54  ;;  %v531_v3 = vmul.f32 %v1749_v23, %v504_v56  ;;  %v552_v56 = vld [vmem:[#allocation6 + $0x8] sm:$0xff] }
 0x238   :  { %1424 = vmatpush3.bf16.msra.mxu0 %v547_v54 }
 0x239   :  { %v546_v0 = vpack.c.bf16 %v534_v59, %v533_v58 }
 0x23a   :  { %v506_v1 = vpop.permute.xlu0 %505  ;;  %v500_v2 = vpop.permute.xlu1 %499  ;;  %744 = vmatmul.mubr.bf16.gmra.mxu1 %v1505_v57 }
 0x23b   :  { %v532_v4 = vmul.f32 %v1749_v23, %v506_v1  ;;  %1425 = vmatprep.subr.bf16.mxu0 %v546_v0  ;;  %751 = vmatprep.mubr.bf16.mxu1 %v1506_v62  ;;  %v529_v12 = vmul.f32 %v1749_v23, %v500_v2 }
 0x23c   :  { %1426 = vmatpush3.bf16.msra.mxu0 %v546_v0  ;;  %v557_v0 = vld [vmem:[#allocation6 + $0x30] sm:$0xff] }
 0x23d   :  { %v545_v5 = vpack.c.bf16 %v532_v4, %v531_v3 }
 0x23e   :  { %v502_v8 = vpop.permute.xlu0 %501  ;;  %v496_v16 = vpop.permute.xlu1 %495 }
 0x23f   :  { %v530_v14 = vmul.f32 %v1749_v23, %v502_v8  ;;  %1427 = vmatprep.subr.bf16.mxu0 %v545_v5  ;;  %v527_v13 = vmul.f32 %v1749_v23, %v496_v16  ;;  %v558_v16 = vld [vmem:[#allocation6 + $0x38] sm:$0xff] }
 0x240   :  { %1428 = vmatpush3.bf16.msra.mxu0 %v545_v5 }
 0x241   :  { %v544_v6 = vpack.c.bf16 %v530_v14, %v529_v12 }
 0x242   :  { %v498_v7 = vpop.permute.xlu0 %497  ;;  %752 = vmatmul.mubr.bf16.gmra.mxu1 %v1508_v9 }
 0x243   :  { %v528_v18 = vmul.f32 %v1749_v23, %v498_v7  ;;  %1429 = vmatprep.subr.bf16.mxu0 %v544_v6  ;;  %759 = vmatprep.mubr.bf16.mxu1 %v1509_v15  ;;  %v555_v15 = vld [vmem:[#allocation6 + $0x20] sm:$0xff] }
 0x244   :  { %1430 = vmatpush3.bf16.msra.mxu0 %v544_v6 }
 0x245   :  { %v543_v19 = vpack.c.bf16 %v528_v18, %v527_v13 }
 0x247   :  { %1431 = vmatprep.subr.bf16.mxu0 %v543_v19 }
 0x248   :  { %1432 = vmatpush3.bf16.msra.mxu0 %v543_v19  ;;  %v556_v19 = vld [vmem:[#allocation6 + $0x28] sm:$0xff] }
 0x24a   :  { %760 = vmatmul.mubr.bf16.gmra.mxu1 %v1511_v10 }
 0x24b   :  { %1434 = vmatmul.mubr.bf16.vlgmr.msra.gmra.mxu0 %v1513_v11  ;;  %767 = vmatprep.mubr.bf16.mxu1 %v1514_v17 }
 0x24c   :  { %1437 = vmatprep.mubr.bf16.mxu0 %v1517_v20 }
 0x252   :  { %768 = vmatmul.mubr.bf16.gmra.mxu1 %v1516_v21 }
 0x253   :  { %1438 = vmatmul.mubr.bf16.gmra.mxu0 %v1518_v22  ;;  %775 = vmatprep.mubr.bf16.mxu1 %v1519_v60 }
 0x254   :  { %1441 = vmatprep.mubr.bf16.mxu0 %v1522_v61  ;;  %v561_v61 = vld [vmem:[#allocation6 + $0x50] sm:$0xff] }
 0x25a   :  { %776 = vmatmul.mubr.bf16.gmra.mxu1 %v1521_v63 }
 0x25b   :  { %1442 = vmatmul.mubr.bf16.gmra.mxu0 %v1523_v24  ;;  %783 = vmatprep.mubr.bf16.mxu1 %v1524_v25 }
 0x25c   :  { %1445 = vmatprep.mubr.bf16.mxu0 %v1527_v26 }
 0x262   :  { %784 = vmatmul.mubr.bf16.gmra.mxu1 %v1526_v28  ;;  %v559_v28 = vld [vmem:[#allocation6 + $0x40] sm:$0xff] }
 0x263   :  { %1446 = vmatmul.mubr.bf16.gmra.mxu0 %v1528_v29 }
 0x2ea   :  { %v1297_v30 = vpop.f32.mrf.mxu1 }
 0x2ec   :  { %v1298_v31 = vpop.f32.mrf.mxu1 }
 0x2ed   :  { %v1299_v32 = vadd.f32 %v1298_v31, %v1297_v30  ;;  %v562_v31 = vld [vmem:[#allocation6 + $0x58] sm:$0xff] }
 0x2ee   :  { %v1300_v33 = vpop.f32.mrf.mxu1 }
 0x2ef   :  { %v730_v54 = vadd.f32 %v1299_v32, %v551_v50 }
 0x2f0   :  { %v1301_v34 = vpop.f32.mrf.mxu1 }
 0x2f1   :  { %v1302_v35 = vadd.f32 %v1301_v34, %v1300_v33 }
 0x2f2   :  { %v1303_v36 = vpop.f32.mrf.mxu1 }
 0x2f3   :  { %v733_v2 = vadd.f32 %v1302_v35, %v552_v56 }
 0x2f4   :  { %v1304_v37 = vpop.f32.mrf.mxu1 }
 0x2f5   :  { %v2012_v38 = vadd.f32 %v1304_v37, %v1303_v36 }
 0x2f6   :  { %v1306_v39 = vpop.f32.mrf.mxu1 }
 0x2f8   :  { %v1307_v40 = vpop.f32.mrf.mxu1 }
 0x2f9   :  { %v2014_v41 = vadd.f32 %v1307_v40, %v1306_v39 }
 0x2fa   :  { %v1309_v42 = vpop.f32.mrf.mxu1 }
 0x2fc   :  { %v1310_v43 = vpop.f32.mrf.mxu1 }
 0x2fd   :  { %v1311_v4 = vadd.f32 %v1310_v43, %v1309_v42 }
 0x2fe   :  { %v1312_v44 = vpop.f32.mrf.mxu1 }
 0x2ff   :  { %v746_v17 = vadd.f32 %v1311_v4, %v555_v15  ;;  %v565_v15 = vld [vmem:[#allocation6 + $0x70] sm:$0xff] }
 0x300   :  { %v1313_v45 = vpop.f32.mrf.mxu1 }
 0x301   :  { %v1314_v6 = vadd.f32 %v1313_v45, %v1312_v44 }
 0x302   :  { %v1315_v46 = vpop.f32.mrf.mxu1 }
 0x303   :  { %v749_v26 = vadd.f32 %v1314_v6, %v556_v19  ;;  %v564_v19 = vld [vmem:[#allocation6 + $0x68] sm:$0xff] }
 0x304   :  { %v1316_v47 = vpop.f32.mrf.mxu1 }
 0x305   :  { %v1317_v57 = vadd.f32 %v1316_v47, %v1315_v46  ;;  %v560_v47 = vld [vmem:[#allocation6 + $0x48] sm:$0xff] }
 0x306   :  { %v1318_v48 = vpop.f32.mrf.mxu1 }
 0x307   :  { %v754_v12 = vadd.f32 %v1317_v57, %v557_v0 }
 0x308   :  { %v1319_v49 = vpop.f32.mrf.mxu1 }
 0x309   :  { %v1320_v5 = vadd.f32 %v1319_v49, %v1318_v48 }
 0x30a   :  { %v1321_v51 = vpop.f32.mrf.mxu1 }
 0x30b   :  { %v2016_v52 = vpop.f32.mrf.mxu0  ;;  %v757_v21 = vadd.f32 %v1320_v5, %v558_v16 }
 0x30c   :  { %v1322_v53 = vpop.f32.mrf.mxu1 }
 0x30d   :  { %v826_v55 = vpop.f32.mrf.mxu0  ;;  %v1323_v22 = vadd.f32 %v1322_v53, %v1321_v51 }
 0x30e   :  { %v2018_v58 = vadd.f32 %v826_v55, %v730_v54  ;;  %v1324_v59 = vpop.f32.mrf.mxu1 }
 0x30f   :  { %v2020_v62 = vpop.f32.mrf.mxu0  ;;  %v762_v39 = vadd.f32 %v1323_v22, %v559_v28 }
 0x310   :  { %v1325_v1 = vpop.f32.mrf.mxu1 }
 0x311   :  { %v829_v3 = vpop.f32.mrf.mxu0  ;;  %v1326_v36 = vadd.f32 %v1325_v1, %v1324_v59  ;;  %v563_v1 = vld [vmem:[#allocation6 + $0x60] sm:$0xff] }
 0x312   :  { %v2022_v8 = vadd.f32 %v829_v3, %v733_v2  ;;  %v1327_v9 = vpop.f32.mrf.mxu1 }
 0x313   :  { %v1439_v14 = vpop.f32.mrf.mxu0  ;;  %v765_v59 = vadd.f32 %v1326_v36, %v560_v47 }
 0x314   :  { %v851_v7 = vadd.f32 %v1439_v14, %v754_v12  ;;  %v1328_v13 = vpop.f32.mrf.mxu1 }
 0x315   :  { %v842_v18 = vpop.f32.mrf.mxu0  ;;  %v1329_v11 = vadd.f32 %v1328_v13, %v1327_v9 }
 0x316   :  { %v2024_v10 = vmax.f32 %v851_v7, 0.0  ;;  %v1330_v20 = vpop.f32.mrf.mxu1  ;;  %v843_v63 = vadd.f32 %v842_v18, %v746_v17 }
 0x317   :  { %v1440_v60 = vpop.f32.mrf.mxu0  ;;  %v770_v35 = vadd.f32 %v1329_v11, %v561_v61 }
 0x318   :  { %v854_v24 = vadd.f32 %v1440_v60, %v757_v21  ;;  %v1331_v25 = vpop.f32.mrf.mxu1  ;;  %929 = vrot.lane.b32.xlu1 %v2024_v10, %s1621_s6  ;;  %v2030_v40 = vmax.f32 %v843_v63, 0.0  ;;  %v566_v60 = vld [vmem:[#allocation6 + $0x78] sm:$0xff] }
 0x319   :  { %v1332_v29 = vadd.f32 %v1331_v25, %v1330_v20  ;;  %v845_v30 = vpop.f32.mrf.mxu0 }
 0x31a   :  { %v2028_v32 = vmax.f32 %v854_v24, 0.0  ;;  %v846_v33 = vadd.f32 %v845_v30, %v749_v26  ;;  %v1333_v34 = vpop.f32.mrf.mxu1 }
 0x31b   :  { %v1443_v37 = vpop.f32.mrf.mxu0  ;;  %v773_v44 = vadd.f32 %v1332_v29, %v562_v31 }
 0x31c   :  { %v2032_v42 = vmax.f32 %v846_v33, 0.0  ;;  %v1334_v43 = vpop.f32.mrf.mxu1  ;;  %931 = vrot.lane.b32.xlu0 %v2028_v32, %s1621_s6  ;;  %v912_v45 = vpack.c.bf16 %v2028_v32, %v2024_v10  ;;  %v867_v48 = vadd.f32 %v1443_v37, %v770_v35 }
 0x31d   :  { %v858_v46 = vpop.f32.mrf.mxu0  ;;  %v1335_v54 = vadd.f32 %v1334_v43, %v1333_v34  ;;  %v553_v43 = vld [vmem:[#allocation6 + $0x10] sm:$0xff] }
 0x31e   :  { %v859_v49 = vadd.f32 %v858_v46, %v762_v39  ;;  %v1336_v50 = vpop.f32.mrf.mxu1  ;;  %v911_v51 = vpack.c.bf16 %v2032_v42, %v2030_v40  ;;  %v2042_v2 = vmax.f32 %v867_v48, 0.0  ;;  %v1623_v39 = vmov 0.0   ;;  %v554_v46 = vld [vmem:[#allocation6 + $0x18] sm:$0xff] }
 0x31f   :  { %v1444_v53 = vpop.f32.mrf.mxu0  ;;  %v778_v6 = vadd.f32 %v1335_v54, %v563_v1  ;;  %1449 = vmatprep.subr.bf16.mxu1 %v1623_v39  ;;  %v741_v48 = vadd.f32 %v2014_v41, %v554_v46  ;;  %v1531_v41 = vld [vmem:[%s2216_s7 + $0x4] ss:$12 sps:$4 sm:$0xff]   ;;  %1465 = vmatprep.mubr.msk.bf16.mxu1 %vm1624_vm1, %v1623_v39 }
 0x320   :  { %v2040_v55 = vmax.f32 %v859_v49, 0.0  ;;  %v870_v56 = vadd.f32 %v1444_v53, %v773_v44  ;;  %v1337_v57 = vpop.f32.mrf.mxu1  ;;  %v738_v44 = vadd.f32 %v2012_v38, %v553_v43  ;;  %1079 = vmatprep.mubr.bf16.mxu0 %v1531_v41 }
 0x321   :  { %v861_v0 = vpop.f32.mrf.mxu0  ;;  %v1338_v12 = vadd.f32 %v1337_v57, %v1336_v50  ;;  %v838_v38 = vadd.f32 %v2020_v62, %v741_v48  ;;  %v2120_v62 = vmax.f32 %v2022_v8, 0.0 }
 0x322   :  { %v2044_v3 = vmax.f32 %v870_v56, 0.0  ;;  %v862_v4 = vadd.f32 %v861_v0, %v765_v59  ;;  %v1339_v5 = vpop.f32.mrf.mxu1  ;;  %933 = vrot.lane.b32.xlu1 %v2040_v55, %s1621_s6  ;;  %v835_v47 = vadd.f32 %v2016_v52, %v738_v44  ;;  %v2113_v52 = vmax.f32 %v2018_v58, 0.0 }
 0x323   :  { %v1447_v9 = vpop.f32.mrf.mxu0  ;;  %v781_v63 = vadd.f32 %v1338_v12, %v564_v19  ;;  %v2103_v50 = vmax.f32 %v838_v38, 0.0 }
 0x324   :  { %v2048_v14 = vmax.f32 %v862_v4, 0.0  ;;  %v1340_v16 = vpop.f32.mrf.mxu1  ;;  %v914_v7 = vpack.c.bf16 %v2044_v3, %v2042_v2  ;;  %v2096_v49 = vmax.f32 %v835_v47, 0.0 }
 0x325   :  { %v1341_v13 = vadd.f32 %v1340_v16, %v1339_v5  ;;  %v874_v18 = vpop.f32.mrf.mxu0 }
 0x326   :  { %v1342_v11 = vpop.f32.mrf.mxu1  ;;  %935 = vrot.lane.b32.xlu0 %v2048_v14, %s1621_s6  ;;  %937 = vrot.lane.b32.xlu1 %v2042_v2, %s1621_s6  ;;  %v913_v17 = vpack.c.bf16 %v2048_v14, %v2040_v55  ;;  %v875_v22 = vadd.f32 %v874_v18, %v778_v6 }
 0x327   :  { %v786_v20 = vadd.f32 %v1341_v13, %v565_v15  ;;  %v1448_v21 = vpop.f32.mrf.mxu0 }
 0x328   :  { %v1343_v61 = vpop.f32.mrf.mxu1  ;;  %v2062_v30 = vmax.f32 %v875_v22, 0.0 }
 0x329   :  { %v1344_v24 = vadd.f32 %v1343_v61, %v1342_v11  ;;  %v877_v25 = vpop.f32.mrf.mxu0  ;;  %v883_v28 = vadd.f32 %v1447_v9, %v786_v20 }
 0x32a   :  { %v878_v26 = vadd.f32 %v877_v25, %v781_v63  ;;  %939 = vrot.lane.b32.xlu0 %v2044_v3, %s1621_s6  ;;  %993 = vrot.lane.b32.xlu1 %v2042_v2, %s1620_s28 }
 0x32b   :  { %v789_v29 = vadd.f32 %v1344_v24, %v566_v60  ;;  %v903_v35 = vmax.f32 %v883_v28, 0.0 }
 0x32c   :  { %v2064_v31 = vmax.f32 %v878_v26, 0.0 }
 0x32d   :  { %v886_v33 = vadd.f32 %v1448_v21, %v789_v29 }
 0x32e   :  { %995 = vrot.lane.b32.xlu0 %v2044_v3, %s1620_s28  ;;  %941 = vrot.lane.b32.xlu1 %v2062_v30, %s1621_s6  ;;  %v915_v34 = vpack.c.bf16 %v2064_v31, %v2062_v30 }
 0x32f   :  { %v904_v36 = vmax.f32 %v886_v33, 0.0 }
 0x331   :  { %v916_v37 = vpack.c.bf16 %v904_v36, %v903_v35 }
 0x332   :  { %943 = vrot.lane.b32.xlu0 %v2064_v31, %s1621_s6  ;;  %997 = vrot.lane.b32.xlu1 %v2062_v30, %s1620_s28 }
 0x333   :  { %1361 = vmatprep.subr.bf16.mxu0 %v916_v37 }
 0x336   :  { %999 = vrot.lane.b32.xlu0 %v2064_v31, %s1620_s28  ;;  %945 = vrot.lane.b32.xlu1 %v903_v35, %s1621_s6 }
 0x33a   :  { %947 = vrot.lane.b32.xlu0 %v904_v36, %s1621_s6  ;;  %989 = vrot.lane.b32.xlu1 %v2040_v55, %s1620_s28  ;;  %v1534_v55 = vld [vmem:[%s2209_s0] ss:$0 sm:$0xff] }
 0x33e   :  { %991 = vrot.lane.b32.xlu0 %v2048_v14, %s1620_s28  ;;  %1001 = vrot.lane.b32.xlu1 %v903_v35, %s1620_s28 }
 0x342   :  { %1003 = vrot.lane.b32.xlu0 %v904_v36, %s1620_s28  ;;  %925 = vrot.lane.b32.xlu1 %v2030_v40, %s1621_s6 }
 0x346   :  { %927 = vrot.lane.b32.xlu0 %v2032_v42, %s1621_s6  ;;  %985 = vrot.lane.b32.xlu1 %v2024_v10, %s1620_s28 }
 0x34a   :  { %987 = vrot.lane.b32.xlu0 %v2028_v32, %s1620_s28  ;;  %921 = vrot.lane.b32.xlu1 %v2096_v49, %s1621_s6 }
 0x34e   :  { %923 = vrot.lane.b32.xlu0 %v2103_v50, %s1621_s6  ;;  %981 = vrot.lane.b32.xlu1 %v2030_v40, %s1620_s28 }
 0x352   :  { %983 = vrot.lane.b32.xlu0 %v2032_v42, %s1620_s28  ;;  %917 = vrot.lane.b32.xlu1 %v2113_v52, %s1621_s6 }
 0x356   :  { %919 = vrot.lane.b32.xlu0 %v2120_v62, %s1621_s6  ;;  %977 = vrot.lane.b32.xlu1 %v2096_v49, %s1620_s28 }
 0x35a   :  { %979 = vrot.lane.b32.xlu0 %v2103_v50, %s1620_s28  ;;  %973 = vrot.lane.b32.xlu1 %v2113_v52, %s1620_s28 }
 0x35e   :  { %975 = vrot.lane.b32.xlu0 %v2120_v62, %s1620_s28 }
 0x38a   :  { %v930_v58 = vpop.permute.xlu1 %929 }
 0x38b   :  { %v955_v14 = vmul.f32 %v1534_v55, %v930_v58 }
 0x38e   :  { %v932_v8 = vpop.permute.xlu0 %931 }
 0x38f   :  { %v956_v2 = vmul.f32 %v1756_v27, %v932_v8 }
 0x394   :  { %v934_v53 = vpop.permute.xlu1 %933 }
 0x395   :  { %v957_v35 = vmul.f32 %v1756_v27, %v934_v53 }
 0x398   :  { %v936_v54 = vpop.permute.xlu0 %935  ;;  %v938_v56 = vpop.permute.xlu1 %937 }
 0x399   :  { %v959_v24 = vmul.f32 %v1756_v27, %v938_v56  ;;  %v958_v28 = vmul.f32 %v1756_v27, %v936_v54 }
 0x39b   :  { %v969_v3 = vpack.c.bf16 %v958_v28, %v957_v35 }
 0x39c   :  { %v940_v57 = vpop.permute.xlu0 %939  ;;  %v994_v59 = vpop.permute.xlu1 %993 }
 0x39d   :  { %v960_v22 = vmul.f32 %v1756_v27, %v940_v57  ;;  %v910_v57 = vpack.c.bf16 %v2103_v50, %v2096_v49 }
 0x39f   :  { %v970_v29 = vpack.c.bf16 %v960_v22, %v959_v24  ;;  %v1532_v22 = vld [vmem:[%s2216_s7 + $0x8] ss:$12 sps:$4 sm:$0xff]  }
 0x3a0   :  { %v996_v0 = vpop.permute.xlu0 %995  ;;  %v942_v1 = vpop.permute.xlu1 %941 }
 0x3a1   :  { %v961_v21 = vmul.f32 %v1756_v27, %v942_v1 }
 0x3a4   :  { %v944_v4 = vpop.permute.xlu0 %943  ;;  %v998_v5 = vpop.permute.xlu1 %997 }
 0x3a5   :  { %v962_v18 = vmul.f32 %v1756_v27, %v944_v4  ;;  %v1017_v36 = vmul.f32 %v1749_v23, %v998_v5  ;;  %v909_v5 = vpack.c.bf16 %v2120_v62, %v2113_v52 }
 0x3a7   :  { %v971_v60 = vpack.c.bf16 %v962_v18, %v961_v21 }
 0x3a8   :  { %v1000_v9 = vpop.permute.xlu0 %999  ;;  %v946_v12 = vpop.permute.xlu1 %945 }
 0x3a9   :  { %v963_v6 = vmul.f32 %v1756_v27, %v946_v12  ;;  %v1018_v30 = vmul.f32 %v1749_v23, %v1000_v9 }
 0x3ab   :  { %v1027_v43 = vpack.c.bf16 %v1018_v30, %v1017_v36 }
 0x3ac   :  { %v948_v15 = vpop.permute.xlu0 %947  ;;  %v990_v16 = vpop.permute.xlu1 %989 }
 0x3ad   :  { %v964_v13 = vmul.f32 %v1756_v27, %v948_v15  ;;  %v968_v27 = vpack.c.bf16 %v956_v2, %v955_v14 }
 0x3af   :  { %v972_v19 = vpack.c.bf16 %v964_v13, %v963_v6  ;;  %v1529_v6 = vld [vmem:[%s2216_s7] ss:$12 sps:$4 sm:$0xff]  }
 0x3b0   :  { %v992_v11 = vpop.permute.xlu0 %991  ;;  %v1002_v20 = vpop.permute.xlu1 %1001 }
 0x3b1   :  { %1362 = vmatpush3.bf16.msra.mxu0 %v972_v19  ;;  %v1019_v25 = vmul.f32 %v1749_v23, %v1002_v20 }
 0x3b2   :  { %1363 = vmatprep.subr.bf16.mxu0 %v915_v34 }
 0x3b4   :  { %v1004_v61 = vpop.permute.xlu0 %1003  ;;  %v926_v63 = vpop.permute.xlu1 %925 }
 0x3b5   :  { %v1020_v26 = vmul.f32 %v1749_v23, %v1004_v61  ;;  %1364 = vmatpush3.bf16.msra.mxu0 %v971_v60  ;;  %v953_v58 = vmul.f32 %v1534_v55, %v926_v63 }
 0x3b6   :  { %1365 = vmatprep.subr.bf16.mxu0 %v914_v7  ;;  %v2160_v7 = vld [vmem:[%s2210_s1] ss:$0 sm:$0xff] }
 0x3b7   :  { %v1028_v31 = vpack.c.bf16 %v1020_v26, %v1019_v25  ;;  %v1016_v37 = vmul.f32 %v2160_v7, %v996_v0  ;;  %v1014_v47 = vmul.f32 %v2160_v7, %v992_v11  ;;  %v1013_v8 = vmul.f32 %v2160_v7, %v990_v16 }
 0x3b8   :  { %v928_v33 = vpop.permute.xlu0 %927  ;;  %v986_v34 = vpop.permute.xlu1 %985 }
 0x3b9   :  { %1366 = vmatpush3.bf16.msra.mxu0 %v970_v29  ;;  %1450 = vmatpush3.bf16.msra.mxu1 %v1028_v31  ;;  %v954_v48 = vmul.f32 %v1534_v55, %v928_v33  ;;  %v1025_v10 = vpack.c.bf16 %v1014_v47, %v1013_v8  ;;  %v1030_v29 = vstv %s1029_s24 }
 0x3ba   :  { %1367 = vmatprep.subr.bf16.mxu0 %v913_v17  ;;  %1451 = vmatprep.subr.bf16.mxu1 %v1623_v39  ;;  %v1015_v17 = vmul.f32 %v2160_v7, %v994_v59  ;;  %v1011_v59 = vmul.f32 %v2160_v7, %v986_v34 }
 0x3bb   :  { %v967_v32 = vpack.c.bf16 %v954_v48, %v953_v58 }
 0x3bc   :  { %v988_v23 = vpop.permute.xlu0 %987  ;;  %v922_v44 = vpop.permute.xlu1 %921  ;;  %v1026_v46 = vpack.c.bf16 %v1016_v37, %v1015_v17  ;;  %v1131_v37 = vld [vmem:[%s2217_s8] sm:$0xff] }
 0x3bd   :  { %1368 = vmatpush3.bf16.msra.mxu0 %v969_v3  ;;  %1452 = vmatpush3.bf16.msra.mxu1 %v1027_v43  ;;  %v951_v0 = vmul.f32 %v1534_v55, %v922_v44  ;;  %v1203_v43 = vstv %s1269_s4 }
 0x3be   :  { %1369 = vmatprep.subr.bf16.mxu0 %v912_v45  ;;  %1453 = vmatprep.subr.bf16.mxu1 %v1623_v39  ;;  %v1012_v45 = vmul.f32 %v2160_v7, %v988_v23 }
 0x3c0   :  { %v924_v38 = vpop.permute.xlu0 %923  ;;  %v982_v41 = vpop.permute.xlu1 %981  ;;  %v1024_v40 = vpack.c.bf16 %v1012_v45, %v1011_v59 }
 0x3c1   :  { %1370 = vmatpush3.bf16.msra.mxu0 %v968_v27  ;;  %1454 = vmatpush3.bf16.msra.mxu1 %v1026_v46  ;;  %v952_v53 = vmul.f32 %v1534_v55, %v924_v38  ;;  %v1009_v9 = vmul.f32 %v2160_v7, %v982_v41 }
 0x3c2   :  { %1371 = vmatprep.subr.bf16.mxu0 %v911_v51  ;;  %1455 = vmatprep.subr.bf16.mxu1 %v1623_v39 }
 0x3c3   :  { %v966_v42 = vpack.c.bf16 %v952_v53, %v951_v0 }
 0x3c4   :  { %v984_v54 = vpop.permute.xlu0 %983  ;;  %v918_v56 = vpop.permute.xlu1 %917 }
 0x3c5   :  { %1372 = vmatpush3.bf16.msra.mxu0 %v967_v32  ;;  %1456 = vmatpush3.bf16.msra.mxu1 %v1025_v10  ;;  %v1010_v51 = vmul.f32 %v2160_v7, %v984_v54  ;;  %v949_v49 = vmul.f32 %v1534_v55, %v918_v56 }
 0x3c6   :  { %1373 = vmatprep.subr.bf16.mxu0 %v910_v57  ;;  %1457 = vmatprep.subr.bf16.mxu1 %v1623_v39 }
 0x3c7   :  { %v1023_v12 = vpack.c.bf16 %v1010_v51, %v1009_v9 }
 0x3c8   :  { %v920_v1 = vpop.permute.xlu0 %919  ;;  %v978_v4 = vpop.permute.xlu1 %977 }
 0x3c9   :  { %v950_v50 = vmul.f32 %v1534_v55, %v920_v1  ;;  %1374 = vmatpush3.bf16.msra.mxu0 %v966_v42  ;;  %1458 = vmatpush3.bf16.msra.mxu1 %v1024_v40  ;;  %v1007_v13 = vmul.f32 %v2160_v7, %v978_v4 }
 0x3ca   :  { %1375 = vmatprep.subr.bf16.mxu0 %v909_v5  ;;  %1459 = vmatprep.subr.bf16.mxu1 %v1623_v39 }
 0x3cb   :  { %v965_v15 = vpack.c.bf16 %v950_v50, %v949_v49 }
 0x3cc   :  { %v980_v16 = vpop.permute.xlu0 %979  ;;  %v974_v62 = vpop.permute.xlu1 %973 }
 0x3cd   :  { %v1008_v52 = vmul.f32 %v2160_v7, %v980_v16  ;;  %1376 = vmatpush3.bf16.msra.mxu0 %v965_v15  ;;  %1460 = vmatpush3.bf16.msra.mxu1 %v1023_v12  ;;  %v1005_v11 = vmul.f32 %v2160_v7, %v974_v62 }
 0x3ce   :  { %1461 = vmatprep.subr.bf16.mxu1 %v1623_v39  ;;  %1469 = vmatprep.subr.mxu0 %v1623_v39 }
 0x3cf   :  { %v1022_v18 = vpack.c.bf16 %v1008_v52, %v1007_v13 }
 0x3d0   :  { %v976_v19 = vpop.permute.xlu0 %975  ;;  %1080 = vmatmul.mubr.bf16.vlgmr.msra.gmra.mxu0 %v1529_v6 }
 0x3d1   :  { %v1006_v20 = vmul.f32 %v2160_v7, %v976_v19  ;;  %1462 = vmatpush3.bf16.msra.mxu1 %v1022_v18  ;;  %1473 = vmatprep.mubr.msk.f32.mxu0 %vm1624_vm1, %v1623_v39 }
 0x3d2   :  { %1463 = vmatprep.subr.bf16.mxu1 %v1623_v39 }
 0x3d3   :  { %v1021_v21 = vpack.c.bf16 %v1006_v20, %v1005_v11 }
 0x3d5   :  { %1464 = vmatpush3.bf16.msra.mxu1 %v1021_v21 }
 0x3d8   :  { %1466 = vmatmul.mubr.bf16.vlgmr.msra.gmra.mxu1 %v1532_v22 }
 0x490   :  { %v1377_v60 = vpop.f32.mrf.mxu0 }
 0x492   :  { %v1378_v61 = vpop.f32.mrf.mxu0 }
 0x493   :  { %v1379_v28 = vadd.f32 %v1378_v61, %v1377_v60 }
 0x494   :  { %v1380_v63 = vpop.f32.mrf.mxu0 }
 0x495   :  { %v1082_v34 = vadd.f32 %v1379_v28, %v1030_v29 }
 0x496   :  { %v1381_v24 = vpop.f32.mrf.mxu0 }
 0x497   :  { %v1382_v25 = vadd.f32 %v1381_v24, %v1380_v63 }
 0x498   :  { %v1122_v26 = vpop.f32.mrf.mxu1 }
 0x499   :  { %v1085_v31 = vadd.f32 %v1382_v25, %v1030_v29  ;;  %v1123_v2 = vadd.f32 %v1122_v26, %v1082_v34 }
 0x49a   :  { %v1467_v30 = vpop.f32.mrf.mxu1 }
 0x49b   :  { %v1129_v7 = vmax.f32 %v1123_v2, 0.0 }
 0x49c   :  { %v1125_v33 = vpop.f32.mrf.mxu1 }
 0x49d   :  { %v1126_v35 = vadd.f32 %v1125_v33, %v1085_v31 }
 0x49e   :  { %v1468_v36 = vpop.f32.mrf.mxu1 }
 0x49f   :  { %v1130_v3 = vmax.f32 %v1126_v35, 0.0 }
 0x4a1   :  { %1470 = vmatpush3.xpose.msra.mxu0 %v1130_v3 }
 0x4a2   :  { %1471 = vmatprep.subr.mxu0 %v1623_v39 }
 0x4a5   :  { %1472 = vmatpush3.xpose.msra.mxu0 %v1129_v7 }
 0x4a8   :  { %1474 = vmatmul.mubr.f32.vlgmr.msra.gmra.mxu0 %v1131_v37 }
 0x568   :  { %v1198_v23 = vpop.f32.mrf.mxu0 }
 0x569   :  { %v1204_v44 = vadd.f32 %v1203_v43, %v1198_v23 }
 0x56a   :  { %v1475_v55 = vpop.f32.mrf.mxu0 }
 0x56b   :  { %1206 = vst.msk [vmem:[#allocation9] sm:$0x1] %vm1205_vm2, %v1204_v44 }
 0x56c   :  { %1598 = shalt.err (!%p1595_p5)
}
 0x56d   :  { %1216 = dma.vmem_to_hbm [thread:$0]  %s1214_s27, 16, %s2219_s10, [#allocation4]  }
 0x56e   :  { %1613 = dma.done.wait [#allocation4], 16  }
 0x56f   :  { %1614 = vsyncadd [#allocation4], 4294967280 }
 0x570   :  { %1220 = vsyncpa [#allocation3], 1 }
 0x571   :  { %1221 = vsyncpa [#allocation7], 1 }
 0x572   :  { %1222 = vsyncpa [#allocation4], 1 }
 0x573   :  { %1223 = vsyncpa [#allocation5], 1 }

</bundles_post_ra>
